<compile_context>
chip_gen: v7x
topology: tpu7x:2x2x1
jax: 0.10.0
libtpu: 0.0.40
codegen_flags: <defaults>
</compile_context>

<pallas_src>
import jax
import jax.numpy as jnp
from jax.experimental import pallas as pl
from jax.experimental.pallas import tpu as pltpu


# ----------------------------------------------------------------------------
# Deterministic parameter initialization (mirrors init_utils semantics)
# ----------------------------------------------------------------------------
def sparse_tensor_init(key, M, N, connectivity=10):
    """Sparse input kernel: each column has `connectivity` non-zeros drawn
    uniform(-1, 1); the rest are zero."""
    C = min(M, connectivity)
    k_rows, k_vals = jax.random.split(key)
    rows = jnp.stack(
        [jax.random.permutation(jax.random.fold_in(k_rows, j), M)[:C] for j in range(N)],
        axis=1,
    )  # [C, N]
    vals = jax.random.uniform(k_vals, (C, N), minval=-1.0, maxval=1.0)
    W = jnp.zeros((M, N), dtype=jnp.float32)
    cols = jnp.broadcast_to(jnp.arange(N)[None, :], (C, N))
    W = W.at[rows, cols].set(vals)
    return W


def init_orthogonal_cycle(M):
    """Cyclic (circular shift) orthogonal matrix: W[i, (i+1) % M] = 1."""
    eye = jnp.eye(M, dtype=jnp.float32)
    return jnp.roll(eye, shift=1, axis=1)


def init_bias(key, M, bias_scaling):
    return (jax.random.uniform(key, (1, M), minval=-1.0, maxval=1.0)
            * bias_scaling).astype(jnp.float32)


# ----------------------------------------------------------------------------
# Single-step kernel:  out = roll(h_prev, +1) + x @ W_in + bias
# (roll(h, +1) along lanes is exactly h @ W_rec for the cyclic permutation)
# ----------------------------------------------------------------------------
def memory_cell_kernel(x_ref, h_ref, win_ref, b_ref, out_ref):
    state_part = pltpu.roll(h_ref[...], shift=1, axis=1)            # XLU
    input_part = jnp.dot(x_ref[...], win_ref[...],                   # MXU
                         preferred_element_type=jnp.float32)
    out_ref[...] = state_part + input_part + b_ref[...]


def memory_cell_forward(x, h_prev, w_in, bias):
    """One step of the module's forward. Gridless, everything VMEM-resident."""
    B, in_size = x.shape
    n_units = w_in.shape[1]
    assert h_prev.shape == (B, n_units)
    assert w_in.shape == (in_size, n_units)
    assert bias.shape == (1, n_units)

    vmem = pl.BlockSpec(memory_space=pltpu.MemorySpace.VMEM)
    return pl.pallas_call(
        memory_cell_kernel,
        out_shape=jax.ShapeDtypeStruct((B, n_units), jnp.float32),
        in_specs=[vmem, vmem, vmem, vmem],
        out_specs=vmem,
    )(x, h_prev, w_in, bias)


# ----------------------------------------------------------------------------
# Fused, time-tiled T-step recurrence: one pallas_call for the whole scan.
#   Per grid step (one time tile of TT steps):
#     u[TT,B,N] = (x_tile reshaped to [TT*B, in]) @ W_in + bias   (one MXU matmul)
#     for i in range(TT):  h = roll(h, +1) + u[i];  hseq[i] = h   (unrolled)
# ----------------------------------------------------------------------------
def memory_cell_scan_kernel(x_ref, win_ref, b_ref, h0_ref, hseq_ref, h_scr, u_scr):
    t = pl.program_id(0)

    @pl.when(t == 0)
    def _():
        h_scr[...] = h0_ref[...]

    TT, B, in_size = x_ref.shape
    n_units = win_ref.shape[1]

    # Fused input projection for the whole time tile (non-recurrent part),
    # with the bias folded in once -> nothing but roll+add in the hot loop.
    x2d = x_ref[...].reshape(TT * B, in_size)
    u2d = jnp.dot(x2d, win_ref[...], preferred_element_type=jnp.float32)
    u_scr[...] = u2d.reshape(TT, B, n_units) + b_ref[...]

    def body(i, h):
        h_new = pltpu.roll(h, shift=1, axis=1) + u_scr[i]
        hseq_ref[i] = h_new
        return h_new

    h_scr[...] = jax.lax.fori_loop(0, TT, body, h_scr[...], unroll=True)


def _choose_time_tile(T, B, in_size, n_units, vmem_budget_bytes=4 * 1024 * 1024):
    """Largest divisor of T whose tile (double-buffered x + out, plus the u
    scratch) fits a conservative VMEM budget (safe on v7x's smaller VMEM)."""
    per_step_bytes = 4 * (2 * B * in_size + 2 * B * n_units + B * n_units)
    tt = max(1, min(T, vmem_budget_bytes // max(per_step_bytes, 1)))
    while T % tt:
        tt -= 1
    return tt


def memory_cell_scan(x_seq, h0, w_in, bias):
    T, B, in_size = x_seq.shape
    n_units = w_in.shape[1]
    assert h0.shape == (B, n_units)
    assert w_in.shape == (in_size, n_units)
    assert bias.shape == (1, n_units)

    TT = _choose_time_tile(T, B, in_size, n_units)

    return pl.pallas_call(
        memory_cell_scan_kernel,
        out_shape=jax.ShapeDtypeStruct((T, B, n_units), jnp.float32),
        grid_spec=pltpu.PrefetchScalarGridSpec(
            num_scalar_prefetch=0,
            grid=(T // TT,),
            in_specs=[
                pl.BlockSpec((TT, B, in_size), lambda t: (t, 0, 0)),   # x tile streamed
                pl.BlockSpec((in_size, n_units), lambda t: (0, 0)),    # W_in resident
                pl.BlockSpec((1, n_units), lambda t: (0, 0)),          # bias resident
                pl.BlockSpec((B, n_units), lambda t: (0, 0)),          # h0 resident
            ],
            out_specs=pl.BlockSpec((TT, B, n_units), lambda t: (t, 0, 0)),
            scratch_shapes=[
                pltpu.VMEM((B, n_units), jnp.float32),        # carried hidden state
                pltpu.VMEM((TT, B, n_units), jnp.float32),    # per-tile u = x@W_in + b
            ],
        ),
        compiler_params=pltpu.CompilerParams(
            # Sequential recurrence carried in VMEM scratch: MUST stay "arbitrary".
            dimension_semantics=("arbitrary",)),
    )(x_seq, w_in, bias, h0)


# ----------------------------------------------------------------------------
if __name__ == "__main__":
    B = 8           # batch
    IN_SIZE = 32    # external input size
    N_UNITS = 128   # reservoir memory units
    T = 16          # timesteps for the fused scan demo
    IN_SCALING = 0.5
    BIAS_SCALING = 0.1

    key = jax.random.PRNGKey(0)
    k_win, k_bias, k_x, k_h, k_seq = jax.random.split(key, 5)

    # Parameters (deterministic, synthetic — shapes from __init__).
    w_in = sparse_tensor_init(k_win, IN_SIZE, N_UNITS) * IN_SCALING
    w_rec = init_orthogonal_cycle(N_UNITS)   # used only for the reference checks
    bias = init_bias(k_bias, N_UNITS, BIAS_SCALING)

    # --- single-step forward (matches the module's forward) ------------------
    x = jax.random.normal(k_x, (B, IN_SIZE), dtype=jnp.float32)
    h_prev = jax.random.normal(k_h, (B, N_UNITS), dtype=jnp.float32)

    out = jax.block_until_ready(memory_cell_forward(x, h_prev, w_in, bias))
    ref = h_prev @ w_rec + x @ w_in + bias    # guards the roll-for-W_rec substitution
    assert out.shape == (B, N_UNITS)
    assert jnp.allclose(out, ref, atol=1e-4, rtol=1e-4)

    # --- fused, time-tiled T-step recurrence ---------------------------------
    x_seq = jax.random.normal(k_seq, (T, B, IN_SIZE), dtype=jnp.float32)
    h_seq = jax.block_until_ready(memory_cell_scan(x_seq, h_prev, w_in, bias))
    assert h_seq.shape == (T, B, N_UNITS)

    h = h_prev
    for t in range(T):
        h = h @ w_rec + x_seq[t] @ w_in + bias       # module forward, per step
        assert jnp.allclose(h_seq[t], h, atol=1e-3, rtol=1e-3)

    print("KERNEL_OK")
</pallas_src>

<mosaic_0001>
module attributes {stable_mosaic.version = 11 : i64} {
  func.func @memory_cell_kernel(%arg0: memref<8x32xf32, #tpu.memory_space<vmem>>, %arg1: memref<8x128xf32, #tpu.memory_space<vmem>>, %arg2: memref<32x128xf32, #tpu.memory_space<vmem>>, %arg3: memref<1x128xf32, #tpu.memory_space<vmem>>, %arg4: memref<8x128xf32, #tpu.memory_space<vmem>>) attributes {dimension_semantics = [], scalar_prefetch = 0 : i64, scratch_operands = 0 : i64, tpu.core_type = #tpu.core_type<tc>} {
    %c0 = arith.constant 0 : index
    %c0_0 = arith.constant 0 : index
    %0 = vector.load %arg1[%c0, %c0_0] : memref<8x128xf32, #tpu.memory_space<vmem>>, vector<8x128xf32>
    %c1_i32 = arith.constant 1 : i32
    %1 = tpu.dynamic_rotate %0 by %c1_i32 dim 1 : vector<8x128xf32>, i32 -> vector<8x128xf32>
    %c0_1 = arith.constant 0 : index
    %c0_2 = arith.constant 0 : index
    %2 = vector.load %arg0[%c0_1, %c0_2] : memref<8x32xf32, #tpu.memory_space<vmem>>, vector<8x32xf32>
    %c0_3 = arith.constant 0 : index
    %c0_4 = arith.constant 0 : index
    %3 = vector.load %arg2[%c0_3, %c0_4] : memref<32x128xf32, #tpu.memory_space<vmem>>, vector<32x128xf32>
    %cst = arith.constant dense<0.000000e+00> : vector<8x128xf32>
    %4 = tpu.matmul %2, %3, %cst {dimension_numbers = #tpu.dot_dimension_numbers<[1], [0], [0], [1], [0, 0, 1, 1], [], []>} : vector<8x32xf32>, vector<32x128xf32>, vector<8x128xf32> -> vector<8x128xf32>
    %5 = arith.addf %1, %4 : vector<8x128xf32>
    %c0_5 = arith.constant 0 : index
    %c0_6 = arith.constant 0 : index
    %6 = vector.load %arg3[%c0_5, %c0_6] : memref<1x128xf32, #tpu.memory_space<vmem>>, vector<1x128xf32>
    %7 = vector.broadcast %6 : vector<1x128xf32> to vector<8x128xf32>
    %8 = arith.addf %5, %7 : vector<8x128xf32>
    %c0_7 = arith.constant 0 : index
    %c0_8 = arith.constant 0 : index
    %9 = vector.load %arg4[%c0_7, %c0_8] : memref<8x128xf32, #tpu.memory_space<vmem>>, vector<8x128xf32>
    tpu.vector_store %arg4[%c0_7, %c0_8], %8 {strides = array<i32>} : memref<8x128xf32, #tpu.memory_space<vmem>>, vector<8x128xf32>,
    return
  }
}

</mosaic_0001>

<bundles_post_ra>
// kernel: tpu_custom_call.1
= control target key start
LH: loop header
LB: loop body
LE: loop exit
PB: predicated region body
PF: predicated region fallthrough
CT: control target
= control target key end

     0   :  { %9 = vsyncpa [#allocation3], 0  ;;  %s377_s0 = inlined_call_operand.hbm [shape: f32[8,32], index: 0, kind: input, shape index: {}]   ;;  %s378_s1 = inlined_call_operand.hbm [shape: f32[8,128], index: 1, kind: input, shape index: {}]   ;;  %s379_s2 = inlined_call_operand.hbm [shape: f32[32,128], index: 2, kind: input, shape index: {}]   ;;  %s380_s3 = inlined_call_operand.vmem [shape: f32[1,128], index: 3, kind: input, shape index: {}]   ;;  %s381_s4 = inlined_call_operand.hbm [shape: f32[8,128], index: 4, kind: output, shape index: {}]  }
   0x1   :  { %10 = vsyncpa [#allocation6], 0 }
   0x2   :  { %11 = vsyncpa [#allocation4], 0  ;;  %s291_s15 = smov [#allocation5]   ;;  %s292_s17 = smov [#allocation2]  }
   0x3   :  { %s28_s16 = sshll.u32 %s291_s15, 4  ;;  %s18_s18 = sshll.u32 %s292_s17, 4  ;;  %s29_s16 = int_to_ptr.vmem [resolvable:$true] %s28_s16  ;;  %s19_s18 = int_to_ptr.vmem [resolvable:$true] %s18_s18 }
   0x4   :  { %s197_s21 = scalar_lea.hbm %s378_s1, 128 }
   0x5   :  { %p198_p0 = scmp.ne.s32.totalorder %s378_s1, %s197_s21  ;;  %p201_p1 = scmp.lt.u32.totalorder %s197_s21, %s378_s1 }
   0x7   :  { %p203_p2 = pnand %p201_p1, %p198_p0 }
   0x9   :  { %206 = shalt.err (!%p203_p2)
}
   0xa   :  { %s207_s26 = scalar_lea.vmem %s29_s16, 128  ;;  %p212_p4 = scmp.lt.s32.totalorder %s29_s16, %s29_s16 }
   0xb   :  { %p208_p3 = scmp.ne.s32.totalorder %s29_s16, %s207_s26  ;;  %p213_p5 = scmp.lt.s32.totalorder %s207_s26, %s207_s26 }
   0xd   :  { %p214_p6 = por %p213_p5, %p212_p4 }
   0xf   :  { %p215_p7 = pnand %p214_p6, %p208_p3 }
  0x11   :  { %218 = shalt.err (!%p215_p7)
}
  0x12   :  { %31 = dma.hbm_to_vmem [thread:$0]  %s378_s1, 128, %s29_s16, [#allocation6]  }
  0x13   :  { %s219_s5 = scalar_lea.hbm %s377_s0, 128 }
  0x14   :  { %p220_p8 = scmp.ne.s32.totalorder %s377_s0, %s219_s5  ;;  %p223_p9 = scmp.lt.u32.totalorder %s219_s5, %s377_s0 }
  0x16   :  { %p225_p10 = pnand %p223_p9, %p220_p8 }
  0x18   :  { %228 = shalt.err (!%p225_p10)
}
  0x19   :  { %s229_s10 = scalar_lea.vmem %s19_s18, 128  ;;  %p234_p12 = scmp.lt.s32.totalorder %s19_s18, %s19_s18 }
  0x1a   :  { %p230_p11 = scmp.ne.s32.totalorder %s19_s18, %s229_s10  ;;  %p235_p13 = scmp.lt.s32.totalorder %s229_s10, %s229_s10 }
  0x1c   :  { %p236_p0 = por %p235_p13, %p234_p12 }
  0x1e   :  { %p237_p1 = pnand %p236_p0, %p230_p11 }
  0x20   :  { %240 = shalt.err (!%p237_p1)
}
  0x21   :  { %21 = dma.hbm_to_vmem [thread:$0]  %s377_s0, 128, %s19_s18, [#allocation3]  }
  0x22   :  { %s293_s12 = smov [#allocation7]   ;;  %s241_s16 = scalar_lea.hbm %s379_s2, 512 }
  0x23   :  { %s37_s13 = sshll.u32 %s293_s12, 4  ;;  %p242_p2 = scmp.ne.s32.totalorder %s379_s2, %s241_s16  ;;  %s38_s13 = int_to_ptr.vmem [resolvable:$true] %s37_s13 }
  0x24   :  { %p245_p3 = scmp.lt.u32.totalorder %s241_s16, %s379_s2 }
  0x26   :  { %p247_p4 = pnand %p245_p3, %p242_p2 }
  0x28   :  { %250 = shalt.err (!%p247_p4)
}
  0x29   :  { %s251_s22 = scalar_lea.vmem %s38_s13, 512  ;;  %p256_p6 = scmp.lt.s32.totalorder %s38_s13, %s38_s13 }
  0x2a   :  { %p252_p5 = scmp.ne.s32.totalorder %s38_s13, %s251_s22  ;;  %p257_p7 = scmp.lt.s32.totalorder %s251_s22, %s251_s22 }
  0x2c   :  { %p258_p8 = por %p257_p7, %p256_p6 }
  0x2e   :  { %p259_p9 = pnand %p258_p8, %p252_p5 }
  0x30   :  { %262 = shalt.err (!%p259_p9)
}
  0x31   :  { %s294_s0 = smov 128   ;;  %s295_s18 = smov 8  }
  0x32   :  { %43 = dma.hbm_to_vmem [thread:$0]  %s379_s2, 512, %s38_s13, [#allocation6], %s294_s0, %s294_s0, %s295_s18  }
  0x33   :  { %285 = dma.done.wait [#allocation3], 128  }
  0x34   :  { %286 = vsyncadd [#allocation3], 4294967168 }
  0x35   :  { %287 = dma.done.wait [#allocation6], 640  }
  0x36   :  { %288 = vsyncadd [#allocation6], 4294966656  ;;  %v296_v0 = vmov 0.0|0.0   ;;  %vm297_vm0 = vmmov 0   ;;  %v298_v1 = vmov 0.0   ;;  %v59_v2 = vld [vmem:[#allocation7] sm:$0xff] }
  0x37   :  { %181 = vmatprep.subr.bf16.mxu0 %v296_v0  ;;  %178 = vmatprep.mubr.msk.f32.mxu0 %vm297_vm0, %v298_v1  ;;  %v60_v3 = vld [vmem:[#allocation7 + $0x8] sm:$0xff]  ;;  %v61_v4 = vld [vmem:[#allocation7 + $0x10] sm:$0xff]  ;;  %v62_v6 = vld [vmem:[#allocation7 + $0x18] sm:$0xff]  ;;  %s299_s25 = smov 1   ;;  %vm63_vm1 = vcmask 261120   ;;  %s300_s27 = smov [#allocation8]  }
  0x38   :  { %v182_v5 = vpack.c.bf16 %v60_v3, %v59_v2  ;;  %v55_v7 = vld [vmem:[#allocation5] sm:$0xff]  ;;  %v185_v8 = vpack.c.bf16 %v62_v6, %v61_v4  ;;  %v58_v9 = vld [vmem:[#allocation2] sm:$0xff]  ;;  %s153_s28 = sshll.u32 %s300_s27, 4  ;;  %s154_s28 = int_to_ptr.vmem [resolvable:$true] %s153_s28 }
  0x39   :  { %56 = vrot.lane.b32.xlu0 %v55_v7, %s299_s25  ;;  %v164_v12 = vld [vmem:[%s380_s3] ss:$0 sm:$0xff]  ;;  %s263_s29 = scalar_lea.vmem %s154_s28, 128  ;;  %p268_p11 = scmp.lt.s32.totalorder %s154_s28, %s154_s28 }
  0x3a   :  { %183 = vmatpush3.bf16.msra.mxu0 %v182_v5  ;;  %p264_p10 = scmp.ne.s32.totalorder %s154_s28, %s263_s29  ;;  %p269_p12 = scmp.lt.s32.totalorder %s263_s29, %s263_s29 }
  0x3b   :  { %184 = vmatprep.subr.bf16.mxu0 %v296_v0 }
  0x3c   :  { %p270_p13 = por %p269_p12, %p268_p11 }
  0x3e   :  { %186 = vmatpush3.bf16.msra.mxu0 %v185_v8  ;;  %p271_p0 = pnand %p270_p13, %p264_p10 }
  0x41   :  { %179 = vmatmul.mubr.msk.f32.vlgmr.msra.gmra.mrb[0].mxu0 %vm63_vm1, %v58_v9 }
  0xab   :  { %v57_v10 = vpop.permute.xlu0 %56 }
 0x114   :  { %v133_v11 = vpop.f32.mrb[0].mxu0 }
 0x115   :  { %v137_v13 = vadd.f32 %v133_v11, %v57_v10  ;;  %v180_v14 = vpop.f32.mrb[1].mxu0 }
 0x117   :  { %v145_v15 = vadd.f32 %v164_v12, %v137_v13 }
 0x119   :  { %146 = vst [vmem:[#allocation8] sm:$0xff] %v145_v15 }
 0x11a   :  { %274 = shalt.err (!%p271_p0)
}
 0x11b   :  { %s275_s6 = scalar_lea.hbm %s381_s4, 128 }
 0x11c   :  { %p276_p1 = scmp.ne.s32.totalorder %s381_s4, %s275_s6  ;;  %p279_p2 = scmp.lt.u32.totalorder %s275_s6, %s381_s4 }
 0x11e   :  { %p281_p3 = pnand %p279_p2, %p276_p1 }
 0x120   :  { %284 = shalt.err (!%p281_p3)
}
 0x121   :  { %156 = dma.vmem_to_hbm [thread:$0]  %s154_s28, 128, %s381_s4, [#allocation4]  }
 0x122   :  { %289 = dma.done.wait [#allocation4], 128  }
 0x123   :  { %290 = vsyncadd [#allocation4], 4294967168 }
 0x124   :  { %160 = vsyncpa [#allocation3], 1 }
 0x125   :  { %161 = vsyncpa [#allocation6], 1 }
 0x126   :  { %162 = vsyncpa [#allocation4], 1 }

</bundles_post_ra>
